<compile_context>
chip_gen: v7x
topology: tpu7x:2x2x1
jax: 0.10.0
libtpu: 0.0.40
codegen_flags: <defaults>
</compile_context>

<pallas_src>
import functools

import numpy as np
import jax
import jax.numpy as jnp
from jax.experimental import pallas as pl
from jax.experimental.pallas import tpu as pltpu

TEMPERATURE = 10.0
_MOM_LANES = 128          # lane-aligned width of the moment matrix [1, x, y, 0..]
_MIN_GRID_STEPS = 4       # >= 2 grid steps per TensorCore on v7x, pipelining elsewhere


def _round_up(v, m):
    return ((v + m - 1) // m) * m


def _vmem_limit_bytes():
    """Generation-aware VMEM limit: ~75% of physical, capped at 96 MiB."""
    try:
        cap = int(pltpu.get_tpu_info().vmem_capacity_bytes)
    except Exception:                      # query unavailable -> assume v7x (64 MiB)
        cap = 64 * 1024 * 1024
    return int(min(cap * 3 // 4, 96 * 1024 * 1024))


def _pick_row_tile(rows, hw, in_itemsize, mom_itemsize, vmem_limit):
    """Row tile: multiple of the sublane pack for the input dtype, sized so the
    working set fits the VMEM limit and the grid has at least _MIN_GRID_STEPS
    steps whenever the row count allows it."""
    row_align = max(8, 32 // in_itemsize)          # 8 f32 / 16 bf16 / 32 int8
    # Tile-independent residents: 2x-buffered moment matrix + compiler slack.
    fixed = 2 * hw * _MOM_LANES * mom_itemsize + (4 << 20)
    # Per-row: 2x-buffered input + f32 upcast + f32 exp + bf16 e + 2x f32 output.
    per_row = hw * (2 * in_itemsize + 4 + 4 + 2) + 2 * _MOM_LANES * 4
    budget = max(vmem_limit - fixed, per_row * row_align)
    tm_budget = max(row_align, (budget // per_row) // row_align * row_align)
    rows_aligned = _round_up(rows, row_align)
    tm_steps = max(row_align,
                   (rows_aligned // _MIN_GRID_STEPS) // row_align * row_align)
    return int(min(tm_budget, tm_steps, rows_aligned))


def _soft_argmax_kernel(x_ref, p_ref, o_ref, *, temperature, mxu_dtype):
    """Per-row spatial soft-argmax.

    x_ref: (tm, H*W) block of flattened heatmaps (native dtype).
    p_ref: (H*W, 128) moment matrix, columns [1, pos_x, pos_y, 0, ...].
    o_ref: (tm, 128) lane-dense output; cols [1, E[x], E[y], 0, ...].
    """
    # f32 row softmax (numerically stable on all generations); temperature is
    # folded into the exp argument (max commutes with the positive scale).
    x = x_ref[...].astype(jnp.float32)
    m = jnp.max(x, axis=-1, keepdims=True)
    e = jnp.exp((x - m) * temperature)
    # One bf16 MXU matmul (f32 accumulate) yields per-row
    # [sum(e), sum(e*pos_x), sum(e*pos_y), 0, ...] — replaces two full-tile VPU
    # multiplies + three XLU lane reductions.
    mom = jnp.dot(e.astype(mxu_dtype), p_ref[...],
                  preferred_element_type=jnp.float32)
    inv = pl.reciprocal(mom[:, 0:1], approx=True)       # EUP slot, per-row only
    # Lane-dense store: one unmasked 128-wide vst instead of two 1-lane writes.
    o_ref[...] = mom * inv


def _make_moment_matrix(H, W, dtype):
    """(H*W, 128) matrix with columns [1, pos_x, pos_y, 0...]."""
    hw = H * W
    idx = np.arange(hw)
    p = np.zeros((hw, _MOM_LANES), dtype=np.float32)
    p[:, 0] = 1.0
    p[:, 1] = (idx % W).astype(np.float32)   # column index -> x
    p[:, 2] = (idx // W).astype(np.float32)  # row index    -> y
    return jnp.asarray(p, dtype=dtype)


def spatial_soft_argmax2d(heatmaps, *, row_tile=None):
    """heatmaps: (B, N, H, W) -> (B, N, 2) expected (x, y) coordinates."""
    B, N, H, W = heatmaps.shape
    rows, hw = B * N, H * W

    # keep the native dtype (bf16 heatmaps halve HBM read traffic on v5e);
    # the per-tile f32 upcast happens inside the kernel.
    x = heatmaps.reshape(rows, hw)
    itemsize = jnp.dtype(x.dtype).itemsize

    # bf16 MXU operands: positions 0..255 are exact in bf16; fall back to f32
    # moment columns for larger heatmaps to keep coordinates exact.
    mxu_dtype = jnp.bfloat16 if max(H, W) <= 256 else jnp.float32
    mom_itemsize = jnp.dtype(mxu_dtype).itemsize

    vmem_limit = _vmem_limit_bytes()
    row_align = max(8, 32 // itemsize)
    if row_tile is not None:
        tm = max(row_align, (int(row_tile) // row_align) * row_align)
    else:
        tm = _pick_row_tile(rows, hw, itemsize, mom_itemsize, vmem_limit)

    rows_padded = _round_up(rows, tm)
    if rows_padded != rows:
        # zero rows are harmless: exp(0)=1 everywhere, finite denom, sliced off.
        x = jnp.pad(x, ((0, rows_padded - rows), (0, 0)))

    p = _make_moment_matrix(H, W, mxu_dtype)
    kernel = functools.partial(_soft_argmax_kernel, temperature=TEMPERATURE,
                               mxu_dtype=mxu_dtype)

    out = pl.pallas_call(
        kernel,
        out_shape=jax.ShapeDtypeStruct((rows_padded, _MOM_LANES), jnp.float32),
        grid_spec=pltpu.PrefetchScalarGridSpec(
            num_scalar_prefetch=0,
            grid=(rows_padded // tm,),
            in_specs=[
                pl.BlockSpec((tm, hw), lambda i: (i, 0)),
                # constant index_map: fetched once, stays resident in VMEM.
                pl.BlockSpec((hw, _MOM_LANES), lambda i: (0, 0)),
            ],
            out_specs=pl.BlockSpec((tm, _MOM_LANES), lambda i: (i, 0)),
        ),
        compiler_params=pltpu.CompilerParams(
            # independent row tiles -> shard across the 2 TCs on v7x.
            dimension_semantics=("parallel",),
            vmem_limit_bytes=vmem_limit,
        ),
    )(x, p)

    # lane-dense output: columns [1, E[x], E[y], 0...]; slice the coordinates.
    return out[:rows, 1:3].reshape(B, N, 2)


def p3p_ransac_4dof_forward(pred_heatmaps, target_landmarks, transformation_gt,
                            times=10):
    """Forward pass of P3PRansac_4DOF_layer (tensor hot path in Pallas).

    The heatmap -> 2D landmark extraction is the only on-device tensor compute;
    the masking mirrors the original module (which moves the results to host
    with .cpu().numpy() before the RANSAC loop anyway).
    """
    landmarks_mask = target_landmarks[:, :, 0]
    landmarks_2d_gt = target_landmarks[:, :, 1:3]
    landmarks_3d = target_landmarks[:, :, 3:]

    landmarks_2d = spatial_soft_argmax2d(pred_heatmaps)  # Pallas hot path
    jax.block_until_ready(landmarks_2d)

    # boolean masking produces data-dependent shapes; the reference module
    # immediately pulls these tensors to host for cv2/scipy, so do the same.
    mask = np.asarray(landmarks_mask) > 0.5
    lm2d = np.asarray(landmarks_2d)[mask]
    lm3d = np.asarray(landmarks_3d)[mask]
    lm2d_gt = np.asarray(landmarks_2d_gt)[mask]

    # TODO(synk): cv2.solveP3P RANSAC loop, cv2.Rodrigues / cv2.projectPoints,
    # scipy.optimize.least_squares 4-DOF refinement and scipy Rotation euler
    # conversions are host-side iterative solvers with no Pallas equivalent.
    return landmarks_2d, lm2d, lm3d, lm2d_gt


def _soft_argmax_reference(heatmaps):
    """Pure numpy reference for the kernel (sanity check only)."""
    B, N, H, W = heatmaps.shape
    x = np.asarray(heatmaps).astype(np.float32).reshape(B * N, H * W)
    s = x * TEMPERATURE
    s = s - s.max(axis=-1, keepdims=True)
    e = np.exp(s)
    p = e / e.sum(axis=-1, keepdims=True)
    idx = np.arange(H * W)
    pos_x = (idx % W).astype(np.float32)
    pos_y = (idx // W).astype(np.float32)
    ex = (p * pos_x).sum(-1)
    ey = (p * pos_y).sum(-1)
    return np.stack([ex, ey], axis=-1).reshape(B, N, 2)


if __name__ == "__main__":
    key = jax.random.PRNGKey(0)
    B, N, H, W = 2, 4, 16, 16

    k_hm, k_gt2d, k_3d, k_hm2 = jax.random.split(key, 4)
    pred_heatmaps = jax.random.normal(k_hm, (B, N, H, W), dtype=jnp.float32)

    # target_landmarks: (B, N, 6) = [mask, x_gt, y_gt, X, Y, Z]
    mask = jnp.ones((B, N, 1), dtype=jnp.float32)
    lm2d_gt = jax.random.uniform(k_gt2d, (B, N, 2), minval=0.0, maxval=float(W - 1))
    lm3d = jax.random.normal(k_3d, (B, N, 3), dtype=jnp.float32)
    target_landmarks = jnp.concatenate([mask, lm2d_gt, lm3d], axis=-1)

    transformation_gt = jnp.tile(jnp.eye(4, dtype=jnp.float32)[None], (B, 1, 1))

    landmarks_2d, lm2d_masked, lm3d_masked, lm2d_gt_masked = \
        p3p_ransac_4dof_forward(pred_heatmaps, target_landmarks, transformation_gt)
    jax.block_until_ready(landmarks_2d)

    # correctness check of the Pallas kernel against a numpy reference
    # (tolerance accounts for the bf16 MXU operands + approx EUP reciprocal;
    # sub-0.1px error is far below the 4px RANSAC inlier threshold downstream).
    ref = _soft_argmax_reference(np.asarray(pred_heatmaps))
    np.testing.assert_allclose(np.asarray(landmarks_2d), ref, rtol=5e-3, atol=5e-2)

    # exercise the tiled + padded path (rows not a multiple of the tile) with
    # a forced small row tile and bf16 (native-dtype) input.
    B2, N2 = 3, 7
    hm2 = jax.random.normal(k_hm2, (B2, N2, H, W), dtype=jnp.float32)
    out2 = spatial_soft_argmax2d(hm2.astype(jnp.bfloat16), row_tile=16)
    jax.block_until_ready(out2)
    ref2 = _soft_argmax_reference(np.asarray(hm2.astype(jnp.bfloat16)))
    np.testing.assert_allclose(np.asarray(out2), ref2, rtol=5e-3, atol=5e-2)

    print("KERNEL_OK")
</pallas_src>

<mosaic_0001>
module attributes {stable_mosaic.version = 11 : i64} {
  func.func @_soft_argmax_kernel(%arg0: i32, %arg1: memref<8x256xf32, #tpu.memory_space<vmem>>, %arg2: memref<256x128xbf16, #tpu.memory_space<vmem>>, %arg3: memref<8x128xf32, #tpu.memory_space<vmem>>) attributes {dimension_semantics = [#tpu.dimension_semantics<parallel>], iteration_bounds = array<i64: 1>, scalar_prefetch = 0 : i64, scratch_operands = 0 : i64, tpu.core_type = #tpu.core_type<tc>, window_params = [{transform_indices = @transform_0, window_bounds = array<i64: 8, 256>}, {pipeline_mode = #tpu.pipeline_mode<synchronous>, transform_indices = @transform_1, window_bounds = array<i64: 256, 128>}, {transform_indices = @transform_2, window_bounds = array<i64: 8, 128>}]} {
    %c0 = arith.constant 0 : index
    %c0_0 = arith.constant 0 : index
    %0 = vector.load %arg1[%c0, %c0_0] : memref<8x256xf32, #tpu.memory_space<vmem>>, vector<8x256xf32>
    %cst = arith.constant dense<0xFF800000> : vector<8xf32>
    %1 = vector.multi_reduction <maximumf>, %0, %cst [1] : vector<8x256xf32> to vector<8xf32>
    %2 = vector.shape_cast %1 : vector<8xf32> to vector<8x1xf32>
    %3 = vector.broadcast %2 : vector<8x1xf32> to vector<8x256xf32>
    %4 = arith.subf %0, %3 : vector<8x256xf32>
    %cst_1 = arith.constant 1.000000e+01 : f32
    %5 = vector.broadcast %cst_1 : f32 to vector<8x256xf32>
    %6 = arith.mulf %4, %5 : vector<8x256xf32>
    %7 = math.exp %6 : vector<8x256xf32>
    %8 = arith.truncf %7 : vector<8x256xf32> to vector<8x256xbf16>
    %c0_2 = arith.constant 0 : index
    %c0_3 = arith.constant 0 : index
    %9 = vector.load %arg2[%c0_2, %c0_3] : memref<256x128xbf16, #tpu.memory_space<vmem>>, vector<256x128xbf16>
    %cst_4 = arith.constant dense<0.000000e+00> : vector<8x128xf32>
    %10 = tpu.matmul %8, %9, %cst_4 {dimension_numbers = #tpu.dot_dimension_numbers<[1], [0], [0], [1], [0, 0, 1, 1], [], []>} : vector<8x256xbf16>, vector<256x128xbf16>, vector<8x128xf32> -> vector<8x128xf32>
    %11 = vector.extract_strided_slice %10 {offsets = [0, 0], sizes = [8, 1], strides = [1, 1]} : vector<8x128xf32> to vector<8x1xf32>
    %12 = tpu.reciprocal %11 {approx = true} : vector<8x1xf32> -> vector<8x1xf32>
    %13 = vector.broadcast %12 : vector<8x1xf32> to vector<8x128xf32>
    %14 = arith.mulf %10, %13 : vector<8x128xf32>
    %c0_5 = arith.constant 0 : index
    %c0_6 = arith.constant 0 : index
    %15 = vector.load %arg3[%c0_5, %c0_6] : memref<8x128xf32, #tpu.memory_space<vmem>>, vector<8x128xf32>
    tpu.vector_store %arg3[%c0_5, %c0_6], %14 {strides = array<i32>} : memref<8x128xf32, #tpu.memory_space<vmem>>, vector<8x128xf32>,
    return
  }
  func.func @transform_0(%arg0: i32) -> (i32, i32) {
    %c0_i32 = arith.constant 0 : i32
    %c0_i32_0 = arith.constant 0 : i32
    return %arg0, %c0_i32 : i32, i32
  }
  func.func @transform_1(%arg0: i32) -> (i32, i32) {
    %c0_i32 = arith.constant 0 : i32
    %c0_i32_0 = arith.constant 0 : i32
    %c0_i32_1 = arith.constant 0 : i32
    return %c0_i32, %c0_i32_0 : i32, i32
  }
  func.func @transform_2(%arg0: i32) -> (i32, i32) {
    %c0_i32 = arith.constant 0 : i32
    %c0_i32_0 = arith.constant 0 : i32
    return %arg0, %c0_i32 : i32, i32
  }
}

</mosaic_0001>

<bundles_post_ra>
// kernel: tpu_custom_call.1
= control target key start
LH: loop header
LB: loop body
LE: loop exit
PB: predicated region body
PF: predicated region fallthrough
CT: control target
= control target key end

     0   :  { %7 = vsyncpa [#allocation3], 0  ;;  %s449_s0 = inlined_call_operand.hbm [shape: f32[8,256], index: 0, kind: input, shape index: {}]   ;;  %s450_s1 = inlined_call_operand.hbm [shape: bf16[256,128], index: 1, kind: input, shape index: {}]   ;;  %s451_s2 = inlined_call_operand.hbm [shape: f32[8,128], index: 2, kind: output, shape index: {}]  }
   0x1   :  { %8 = vsyncpa [#allocation6], 0 }
   0x2   :  { %9 = vsyncpa [#allocation4], 0  ;;  %s385_s9 = smov [#allocation2]   ;;  %s386_s11 = smov [#allocation5]  }
   0x3   :  { %s16_s10 = sshll.u32 %s385_s9, 4  ;;  %s25_s12 = sshll.u32 %s386_s11, 4  ;;  %s17_s10 = int_to_ptr.vmem [resolvable:$true] %s16_s10  ;;  %s406_s12 = int_to_ptr.vmem [resolvable:$true] %s25_s12 }
   0x4   :  { %s313_s15 = scalar_lea.hbm %s449_s0, 256 }
   0x5   :  { %p314_p0 = scmp.ne.s32.totalorder %s449_s0, %s313_s15  ;;  %p317_p1 = scmp.lt.u32.totalorder %s313_s15, %s449_s0 }
   0x7   :  { %p319_p2 = pnand %p317_p1, %p314_p0 }
   0x9   :  { %322 = shalt.err (!%p319_p2)
}
   0xa   :  { %s323_s20 = scalar_lea.vmem %s17_s10, 256  ;;  %p328_p4 = scmp.lt.s32.totalorder %s17_s10, %s17_s10 }
   0xb   :  { %p324_p3 = scmp.ne.s32.totalorder %s17_s10, %s323_s20  ;;  %p329_p5 = scmp.lt.s32.totalorder %s323_s20, %s323_s20 }
   0xd   :  { %p330_p6 = por %p329_p5, %p328_p4 }
   0xf   :  { %p331_p7 = pnand %p330_p6, %p324_p3 }
  0x11   :  { %334 = shalt.err (!%p331_p7)
}
  0x12   :  { %19 = dma.hbm_to_vmem [thread:$0]  %s449_s0, 256, %s17_s10, [#allocation3]  }
  0x13   :  { %s335_s25 = scalar_lea.hbm %s450_s1, 2048 }
  0x14   :  { %p336_p8 = scmp.ne.s32.totalorder %s450_s1, %s335_s25  ;;  %p339_p9 = scmp.lt.u32.totalorder %s335_s25, %s450_s1 }
  0x16   :  { %p341_p10 = pnand %p339_p9, %p336_p8 }
  0x18   :  { %344 = shalt.err (!%p341_p10)
}
  0x19   :  { %s345_s30 = scalar_lea.vmem %s406_s12, 2048  ;;  %p350_p12 = scmp.lt.s32.totalorder %s406_s12, %s406_s12 }
  0x1a   :  { %p346_p11 = scmp.ne.s32.totalorder %s406_s12, %s345_s30  ;;  %p351_p13 = scmp.lt.s32.totalorder %s345_s30, %s345_s30 }
  0x1c   :  { %p352_p0 = por %p351_p13, %p350_p12 }
  0x1e   :  { %p353_p1 = pnand %p352_p0, %p346_p11 }
  0x20   :  { %356 = shalt.err (!%p353_p1)
}
  0x21   :  { %s387_s0 = smov 64   ;;  %s388_s3 = smov 4  }
  0x22   :  { %31 = dma.hbm_to_vmem [thread:$0]  %s450_s1, 2048, %s406_s12, [#allocation6], %s387_s0, %s387_s0, %s388_s3  }
  0x23   :  { %379 = dma.done.wait [#allocation3], 256  }
  0x24   :  { %380 = vsyncadd [#allocation3], 4294967040 }
  0x25   :  { %381 = dma.done.wait [#allocation6], 2048  }
  0x26   :  { %382 = vsyncadd [#allocation6], 4294965248  ;;  %v39_v0 = vld [vmem:[#allocation2] sm:$0xff]  ;;  %v40_v1 = vld [vmem:[#allocation2 + $0x8] sm:$0xff]  ;;  %v389_v30 = vmov 0   ;;  %s390_s1 = smov [#allocation7]  }
  0x27   :  { %v41_v2 = vmax.f32 %v39_v0, %v40_v1  ;;  %v291_v3 = vld [vmem:[#allocation5 + $0x40] sm:$0xff]   ;;  %v293_v5 = vld [vmem:[#allocation5 + $0x48] sm:$0xff]   ;;  %v295_v7 = vld [vmem:[#allocation5 + $0x50] sm:$0xff]   ;;  %290 = vset.pattern.permute.xlu0 %v389_v30  ;;  %s236_s6 = sshll.u32 %s390_s1, 4  ;;  %s237_s6 = int_to_ptr.vmem [resolvable:$true] %s236_s6 }
  0x28   :  { %v292_v4 = vld [vmem:[#allocation5] sm:$0xff]   ;;  %262 = vmatprep.subr.bf16.mxu0 %v291_v3  ;;  %v294_v6 = vld [vmem:[#allocation5 + $0x8] sm:$0xff]   ;;  %v296_v8 = vld [vmem:[#allocation5 + $0x10] sm:$0xff]   ;;  %s357_s7 = scalar_lea.vmem %s237_s6, 128  ;;  %p362_p3 = scmp.lt.s32.totalorder %s237_s6, %s237_s6 }
  0x29   :  { %42 = vmax.xlane.f32.xlu0 %v41_v2  ;;  %263 = vmatpush3.bf16.msra.mxu0 %v292_v4  ;;  %v297_v9 = vld [vmem:[#allocation5 + $0x58] sm:$0xff]   ;;  %v299_v11 = vld [vmem:[#allocation5 + $0x60] sm:$0xff]   ;;  %v301_v13 = vld [vmem:[#allocation5 + $0x68] sm:$0xff]   ;;  %p358_p2 = scmp.ne.s32.totalorder %s237_s6, %s357_s7  ;;  %p363_p4 = scmp.lt.s32.totalorder %s357_s7, %s357_s7 }
  0x2a   :  { %264 = vmatprep.subr.bf16.mxu0 %v293_v5  ;;  %v298_v10 = vld [vmem:[#allocation5 + $0x18] sm:$0xff]   ;;  %v300_v12 = vld [vmem:[#allocation5 + $0x20] sm:$0xff]   ;;  %v302_v14 = vld [vmem:[#allocation5 + $0x28] sm:$0xff]  }
  0x2b   :  { %v303_v15 = vld [vmem:[#allocation5 + $0x70] sm:$0xff]   ;;  %v305_v17 = vld [vmem:[#allocation5 + $0x78] sm:$0xff]   ;;  %p364_p5 = por %p363_p4, %p362_p3 }
  0x2c   :  { %v304_v16 = vld [vmem:[#allocation5 + $0x30] sm:$0xff]   ;;  %v306_v18 = vld [vmem:[#allocation5 + $0x38] sm:$0xff]  }
  0x2d   :  { %265 = vmatpush3.bf16.msra.mxu0 %v294_v6  ;;  %p365_p6 = pnand %p364_p5, %p358_p2 }
  0x2e   :  { %266 = vmatprep.subr.bf16.mxu0 %v295_v7 }
  0x31   :  { %267 = vmatpush3.bf16.msra.mxu0 %v296_v8 }
  0x32   :  { %268 = vmatprep.subr.bf16.mxu0 %v297_v9 }
  0x35   :  { %269 = vmatpush3.bf16.msra.mxu0 %v298_v10 }
  0x36   :  { %270 = vmatprep.subr.bf16.mxu0 %v299_v11 }
  0x39   :  { %271 = vmatpush3.bf16.msra.mxu0 %v300_v12 }
  0x3a   :  { %272 = vmatprep.subr.bf16.mxu0 %v301_v13 }
  0x3d   :  { %273 = vmatpush3.bf16.msra.mxu0 %v302_v14 }
  0x3e   :  { %274 = vmatprep.subr.bf16.mxu0 %v303_v15 }
  0x41   :  { %275 = vmatpush3.bf16.msra.mxu0 %v304_v16 }
  0x42   :  { %276 = vmatprep.subr.bf16.mxu0 %v305_v17 }
  0x45   :  { %277 = vmatpush3.bf16.msra.mxu0 %v306_v18 }
  0xb6   :  { %v43_v19 = vpop.xlane.xlu0 %42 }
  0xb7   :  { %v44_v20 = vsub.f32 %v39_v0, %v43_v19  ;;  %v45_v21 = vsub.f32 %v40_v1, %v43_v19 }
  0xb9   :  { %v46_v22 = vmul.f32 10.0, %v44_v20  ;;  %v47_v23 = vmul.f32 10.0, %v45_v21 }
  0xbb   :  { %v48_v24 = vmul.f32 1.442695, %v46_v22  ;;  %v50_v25 = vmul.f32 1.442695, %v47_v23 }
  0xbd   :  { %307 = vpow2.f32 %v48_v24 }
  0xbe   :  { %309 = vpow2.f32 %v50_v25 }
  0xc7   :  { %v308_v26 = vpop.eup %307 }
  0xc8   :  { %v310_v27 = vpop.eup %309  ;;  %v52_v28 = vpack.c.bf16 %v308_v26, %v308_v26 }
  0xc9   :  { %v53_v29 = vpack.c.bf16 %v310_v27, %v310_v27 }
  0xcb   :  { %214 = vmatprep.mubr.bf16.mxu0 %v53_v29 }
  0xcc   :  { %215 = vmatmul.mubr.bf16.vlgmr.msra.gmra.mrb[0].mxu0 %v52_v28 }
 0x19f   :  { %v278_v31 = vpop.f32.mrb[0].mxu0 }
 0x1a0   :  { %v279_v32 = vpop.f32.mrb[1].mxu0 }
 0x1a1   :  { %v280_v33 = vadd.f32 %v279_v32, %v278_v31  ;;  %v281_v34 = vpop.f32.mrb[2].mxu0 }
 0x1a2   :  { %v282_v35 = vpop.f32.mrb[3].mxu0 }
 0x1a3   :  { %311 = vrcp.f32 %v280_v33 }
 0x1ad   :  { %v312_v36 = vpop.eup %311 }
 0x1ae   :  { %225 = vperm.xlu0 %290, %v312_v36  }
 0x22d   :  { %v226_v37 = vpop.permute.xlu0 %225 }
 0x22e   :  { %v228_v38 = vmul.f32 %v280_v33, %v226_v37 }
 0x230   :  { %229 = vst [vmem:[#allocation7] sm:$0xff] %v228_v38 }
 0x231   :  { %368 = shalt.err (!%p365_p6)
}
 0x232   :  { %s369_s10 = scalar_lea.hbm %s451_s2, 128 }
 0x233   :  { %p370_p7 = scmp.ne.s32.totalorder %s451_s2, %s369_s10  ;;  %p373_p8 = scmp.lt.u32.totalorder %s369_s10, %s451_s2 }
 0x235   :  { %p375_p9 = pnand %p373_p8, %p370_p7 }
 0x237   :  { %378 = shalt.err (!%p375_p9)
}
 0x238   :  { %239 = dma.vmem_to_hbm [thread:$0]  %s237_s6, 128, %s451_s2, [#allocation4]  }
 0x239   :  { %383 = dma.done.wait [#allocation4], 128  }
 0x23a   :  { %384 = vsyncadd [#allocation4], 4294967168 }
 0x23b   :  { %243 = vsyncpa [#allocation3], 1 }
 0x23c   :  { %244 = vsyncpa [#allocation6], 1 }
 0x23d   :  { %245 = vsyncpa [#allocation4], 1 }

</bundles_post_ra>
